<compile_context>
chip_gen: v6e
topology: v6e:2x2x1
jax: 0.10.0
libtpu: 0.0.40
codegen_flags: <defaults>
</compile_context>

<pallas_src>
import functools

import jax
import jax.numpy as jnp
from jax.experimental import pallas as pl
from jax.experimental.pallas import tpu as pltpu


def _energy_kernel(x_ref, w_ref, b1_ref, w2_ref, b2_ref, e_ref, *, pack, hidden):
    """One atom-tile of the MACE-style per-atom energy readout (transposed orientation).

    x_ref  : (TILE_N/pack, pack*F_IN)   bf16  packed node-feature tile (pack atoms per row)
    w_ref  : (pack*F_IN, pack*HIDDEN)   bf16  resident block-diagonal weight
    b1_ref : (pack*HIDDEN, 1)           f32   resident bias column (b1 tiled `pack` times)
    w2_ref : (pack*HIDDEN, 1)           f32   resident readout column (w2 tiled `pack` times)
    b2_ref : (1, 1)                     f32   scalar bias in SMEM
    e_ref  : (pack, TILE_N/pack)        f32   lane-dense per-atom energies for this tile
    """
    # ht[:, j] = block_diag(W1,...) ^T @ x_packed[j]  ->  (pack*HIDDEN, TILE_N/pack)
    # bf16 MXU matmul, f32 accumulation. Transposed orientation keeps the energy result
    # lane-dense (no cross-lane relayout of TILE_N values).
    ht = jax.lax.dot_general(
        w_ref[...], x_ref[...],
        dimension_numbers=(((0,), (1,)), ((), ())),
        preferred_element_type=jnp.float32,
    )
    ht = ht + b1_ref[...]                                   # lane-broadcast of (P*H, 1)

    # SiLU: x * sigmoid(x), sigmoid via EUP exp + approx reciprocal (no exact-divide refine).
    sig = pl.reciprocal(1.0 + jnp.exp(-ht), approx=True)
    act = ht * sig

    # Per-atom energy: VPU multiply + XLU sublane reduce (already lane-dense (1, TILE_N/pack)).
    weighted = act * w2_ref[...]                            # (pack*HIDDEN, TILE_N/pack)
    rows = [
        jnp.sum(weighted[p * hidden:(p + 1) * hidden, :], axis=0, keepdims=True)
        for p in range(pack)
    ]
    e = rows[0] if pack == 1 else jnp.concatenate(rows, axis=0)   # (pack, TILE_N/pack)
    e_ref[...] = e + b2_ref[0, 0]


def _default_pack() -> int:
    """2-atom MXU row packing wants the 256-wide MXU (v6e / v7x); older chips keep pack=1.

    pack=2 is numerically identical everywhere -- this only changes performance.
    """
    try:
        kind = jax.devices()[0].device_kind.lower()
    except Exception:
        return 2
    for old in ("v2", "v3", "v4", "v5"):
        if old in kind:
            return 1
    return 2


def _block_diag(w, pack):
    if pack == 1:
        return w
    f_in, hidden = w.shape
    out = jnp.zeros((pack * f_in, pack * hidden), w.dtype)
    for p in range(pack):
        out = out.at[p * f_in:(p + 1) * f_in, p * hidden:(p + 1) * hidden].set(w)
    return out


def energy_model_forward(x, params, *, tile_n=2048, pack=None):
    """Synthetic MACE-style energy model forward; hot path in one Pallas kernel.

    tile_n: atoms per grid step. Large tiles (1K-4K) amortize the ~0.35 us per-step
    overhead; VMEM use stays at a few MiB so this is safe on every TPU generation.
    For best v7x megacore balance, choose workloads so the tile count is >= 2 and even.
    """
    n, f_in = x.shape
    hidden = params["w1"].shape[1]

    if pack is None:
        pack = _default_pack()

    # Lane-dense per-atom-energy output needs (tile_n // pack) % 128 == 0.
    quantum = 128 * pack
    tile_n = max(quantum, (tile_n // quantum) * quantum)
    num_tiles = pl.cdiv(n, tile_n)
    padded_n = num_tiles * tile_n

    x_pad = x if padded_n == n else jnp.pad(x, ((0, padded_n - n), (0, 0)))
    # Row-major-contiguous reshape (free): packs `pack` consecutive atoms per MXU row.
    x_packed = x_pad.reshape(padded_n // pack, pack * f_in).astype(jnp.bfloat16)

    w1_bf16 = params["w1"].astype(jnp.bfloat16)
    w_bd = _block_diag(w1_bf16, pack)                                   # (P*F_IN, P*H) bf16
    b1_col = jnp.tile(params["b1"].reshape(hidden, 1).astype(jnp.float32), (pack, 1))
    w2_col = jnp.tile(params["w2"].reshape(hidden, 1).astype(jnp.float32), (pack, 1))
    b2 = params["b2"].reshape(1, 1).astype(jnp.float32)

    kernel = functools.partial(_energy_kernel, pack=pack, hidden=hidden)

    grid_spec = pltpu.PrefetchScalarGridSpec(
        num_scalar_prefetch=0,
        grid=(num_tiles,),
        in_specs=[
            pl.BlockSpec((tile_n // pack, pack * f_in), lambda i: (i, 0)),   # x (pipelined)
            pl.BlockSpec((pack * f_in, pack * hidden), lambda i: (0, 0)),    # W resident
            pl.BlockSpec((pack * hidden, 1), lambda i: (0, 0)),              # b1 col resident
            pl.BlockSpec((pack * hidden, 1), lambda i: (0, 0)),              # w2 col resident
            pl.BlockSpec(memory_space=pltpu.MemorySpace.SMEM),               # b2 scalar
        ],
        out_specs=pl.BlockSpec((pack, tile_n // pack), lambda i: (0, i)),    # lane-dense E
    )

    node_packed = pl.pallas_call(
        kernel,
        out_shape=jax.ShapeDtypeStruct((pack, padded_n // pack), jnp.float32),
        grid_spec=grid_spec,
        compiler_params=pltpu.CompilerParams(
            dimension_semantics=("parallel",),   # atom tiles shard across TCs on v7x
        ),
    )(x_packed, w_bd, b1_col, w2_col, b2)

    # node_packed[p, j] = E_{pack*j + p}; transpose+reshape restores atom order (tiny f32 op).
    node_flat = node_packed.T.reshape(padded_n)[:n]
    node_energy = node_flat.reshape(n, 1)
    energy = jnp.sum(node_flat)                  # tiny XLA reduce; padded atoms excluded
    return {"node_energy": node_energy, "energy": energy}


class TrainingTaskPallas:
    """JAX/Pallas analogue of cuMACE TrainingTask.

    Only the forward pass is reproduced: forward(data, training) delegates to the
    wrapped model, exactly as `return self.model(data, training=training)`.
    """

    def __init__(self, params, tile_n=2048, pack=None):
        self.params = params
        self.tile_n = tile_n
        self.pack = pack

    def forward(self, data, training: bool):
        # `training` has no effect on this deterministic model (no dropout/BN),
        # matching the pass-through semantics of TrainingTask.forward.
        del training
        return energy_model_forward(data["node_features"], self.params,
                                    tile_n=self.tile_n, pack=self.pack)

    __call__ = forward


def init_params(key, f_in=32, hidden=128):
    k1, k2, k3, k4 = jax.random.split(key, 4)
    return {
        "w1": (jax.random.normal(k1, (f_in, hidden), jnp.float32) / jnp.sqrt(f_in)),
        "b1": jax.random.normal(k2, (1, hidden), jnp.float32) * 0.01,
        "w2": (jax.random.normal(k3, (hidden, 1), jnp.float32) / jnp.sqrt(hidden)),
        "b2": jax.random.normal(k4, (1, 1), jnp.float32) * 0.01,
    }


if __name__ == "__main__":
    key = jax.random.PRNGKey(0)
    k_param, k_data = jax.random.split(key)

    # Small shapes; N_ATOMS chosen so the grid has >1 tile and a ragged tail.
    N_ATOMS, F_IN, HIDDEN, TILE_N = 300, 32, 128, 256
    params = init_params(k_param, f_in=F_IN, hidden=HIDDEN)
    x = jax.random.normal(k_data, (N_ATOMS, F_IN), jnp.float32)

    # plain-JAX reference (same bf16-matmul / f32-accumulate recipe as the kernel;
    # sigmoid is exact here, the kernel uses the EUP approx reciprocal -> modest tolerance)
    xb = x.astype(jnp.bfloat16)
    w1b = params["w1"].astype(jnp.bfloat16)
    h_ref = jnp.dot(xb, w1b, preferred_element_type=jnp.float32) + params["b1"]
    h_ref = h_ref * jax.nn.sigmoid(h_ref)
    e_ref = (jnp.sum(h_ref * params["w2"].reshape(1, -1), axis=-1, keepdims=True)
             + params["b2"])

    # Exercise both the packed (v6e/v7x) and unpacked (v5e) MXU paths; both are correct
    # on any generation, only performance differs.
    for pack in (_default_pack(), 1):
        task = TrainingTaskPallas(params, tile_n=TILE_N, pack=pack)
        out = task({"node_features": x}, training=False)

        jax.block_until_ready(out["energy"])
        jax.block_until_ready(out["node_energy"])

        assert out["node_energy"].shape == (N_ATOMS, 1)
        assert jnp.allclose(out["node_energy"], e_ref, atol=2e-2, rtol=2e-2), (
            f"node_energy mismatch (pack={pack})")
        assert jnp.allclose(out["energy"], e_ref.sum(), atol=1.0, rtol=2e-2), (
            f"energy mismatch (pack={pack})")

    print("KERNEL_OK")
</pallas_src>

<mosaic_0001>
module attributes {stable_mosaic.version = 11 : i64} {
  func.func @_energy_kernel(%arg0: i32, %arg1: memref<128x64xbf16, #tpu.memory_space<vmem>>, %arg2: memref<64x256xbf16, #tpu.memory_space<vmem>>, %arg3: memref<256x1xf32, #tpu.memory_space<vmem>>, %arg4: memref<256x1xf32, #tpu.memory_space<vmem>>, %arg5: memref<1x1xf32, #tpu.memory_space<smem>>, %arg6: memref<2x128xf32, #tpu.memory_space<vmem>>) attributes {dimension_semantics = [#tpu.dimension_semantics<parallel>], iteration_bounds = array<i64: 2>, scalar_prefetch = 0 : i64, scratch_operands = 0 : i64, tpu.core_type = #tpu.core_type<tc>, window_params = [{transform_indices = @transform_0, window_bounds = array<i64: 128, 64>}, {pipeline_mode = #tpu.pipeline_mode<synchronous>, transform_indices = @transform_1, window_bounds = array<i64: 64, 256>}, {pipeline_mode = #tpu.pipeline_mode<synchronous>, transform_indices = @transform_2, window_bounds = array<i64: 256, 1>}, {pipeline_mode = #tpu.pipeline_mode<synchronous>, transform_indices = @transform_3, window_bounds = array<i64: 256, 1>}, {transform_indices = @transform_4, window_bounds = array<i64: 1, 1>}, {transform_indices = @transform_5, window_bounds = array<i64: 2, 128>}]} {
    %c0 = arith.constant 0 : index
    %c0_0 = arith.constant 0 : index
    %0 = vector.load %arg2[%c0, %c0_0] : memref<64x256xbf16, #tpu.memory_space<vmem>>, vector<64x256xbf16>
    %c0_1 = arith.constant 0 : index
    %c0_2 = arith.constant 0 : index
    %1 = vector.load %arg1[%c0_1, %c0_2] : memref<128x64xbf16, #tpu.memory_space<vmem>>, vector<128x64xbf16>
    %cst = arith.constant dense<0.000000e+00> : vector<256x128xf32>
    %2 = tpu.matmul %0, %1, %cst {dimension_numbers = #tpu.dot_dimension_numbers<[0], [1], [1], [0], [0, 1, 1, 0], [], []>} : vector<64x256xbf16>, vector<128x64xbf16>, vector<256x128xf32> -> vector<256x128xf32>
    %c0_3 = arith.constant 0 : index
    %c0_4 = arith.constant 0 : index
    %3 = vector.load %arg3[%c0_3, %c0_4] : memref<256x1xf32, #tpu.memory_space<vmem>>, vector<256x1xf32>
    %4 = vector.broadcast %3 : vector<256x1xf32> to vector<256x128xf32>
    %5 = arith.addf %2, %4 : vector<256x128xf32>
    %cst_5 = arith.constant 0.000000e+00 : f32
    %6 = vector.broadcast %cst_5 : f32 to vector<256x128xf32>
    %7 = arith.subf %6, %5 : vector<256x128xf32>
    %8 = math.exp %7 : vector<256x128xf32>
    %cst_6 = arith.constant 1.000000e+00 : f32
    %9 = vector.broadcast %cst_6 : f32 to vector<256x128xf32>
    %10 = arith.addf %9, %8 : vector<256x128xf32>
    %11 = tpu.reciprocal %10 {approx = true} : vector<256x128xf32> -> vector<256x128xf32>
    %12 = arith.mulf %5, %11 : vector<256x128xf32>
    %c0_7 = arith.constant 0 : index
    %c0_8 = arith.constant 0 : index
    %13 = vector.load %arg4[%c0_7, %c0_8] : memref<256x1xf32, #tpu.memory_space<vmem>>, vector<256x1xf32>
    %14 = vector.broadcast %13 : vector<256x1xf32> to vector<256x128xf32>
    %15 = arith.mulf %12, %14 : vector<256x128xf32>
    %16 = vector.extract_strided_slice %15 {offsets = [0, 0], sizes = [128, 128], strides = [1, 1]} : vector<256x128xf32> to vector<128x128xf32>
    %cst_9 = arith.constant dense<0.000000e+00> : vector<128xf32>
    %17 = vector.multi_reduction <add>, %16, %cst_9 [0] : vector<128x128xf32> to vector<128xf32>
    %18 = vector.shape_cast %17 : vector<128xf32> to vector<1x128xf32>
    %19 = vector.extract_strided_slice %15 {offsets = [128, 0], sizes = [128, 128], strides = [1, 1]} : vector<256x128xf32> to vector<128x128xf32>
    %cst_10 = arith.constant dense<0.000000e+00> : vector<128xf32>
    %20 = vector.multi_reduction <add>, %19, %cst_10 [0] : vector<128x128xf32> to vector<128xf32>
    %21 = vector.shape_cast %20 : vector<128xf32> to vector<1x128xf32>
    %22 = tpu.concatenate %18, %21 in 0 : vector<1x128xf32>, vector<1x128xf32> -> vector<2x128xf32>
    %c0_11 = arith.constant 0 : index
    %c0_12 = arith.constant 0 : index
    %23 = memref.load %arg5[%c0_11, %c0_12] : memref<1x1xf32, #tpu.memory_space<smem>>
    %24 = vector.broadcast %23 : f32 to vector<2x128xf32>
    %25 = arith.addf %22, %24 : vector<2x128xf32>
    %c0_13 = arith.constant 0 : index
    %c0_14 = arith.constant 0 : index
    %26 = vector.load %arg6[%c0_13, %c0_14] : memref<2x128xf32, #tpu.memory_space<vmem>>, vector<2x128xf32>
    tpu.vector_store %arg6[%c0_13, %c0_14], %25 {strides = array<i32>} : memref<2x128xf32, #tpu.memory_space<vmem>>, vector<2x128xf32>,
    return
  }
  func.func @transform_0(%arg0: i32) -> (i32, i32) {
    %c0_i32 = arith.constant 0 : i32
    %c0_i32_0 = arith.constant 0 : i32
    return %arg0, %c0_i32 : i32, i32
  }
  func.func @transform_1(%arg0: i32) -> (i32, i32) {
    %c0_i32 = arith.constant 0 : i32
    %c0_i32_0 = arith.constant 0 : i32
    %c0_i32_1 = arith.constant 0 : i32
    return %c0_i32, %c0_i32_0 : i32, i32
  }
  func.func @transform_2(%arg0: i32) -> (i32, i32) {
    %c0_i32 = arith.constant 0 : i32
    %c0_i32_0 = arith.constant 0 : i32
    %c0_i32_1 = arith.constant 0 : i32
    return %c0_i32, %c0_i32_0 : i32, i32
  }
  func.func @transform_3(%arg0: i32) -> (i32, i32) {
    %c0_i32 = arith.constant 0 : i32
    %c0_i32_0 = arith.constant 0 : i32
    %c0_i32_1 = arith.constant 0 : i32
    return %c0_i32, %c0_i32_0 : i32, i32
  }
  func.func @transform_4(%arg0: i32) -> (i32, i32) {
    %c0_i32 = arith.constant 0 : i32
    %c0_i32_0 = arith.constant 0 : i32
    %c0_i32_1 = arith.constant 0 : i32
    return %c0_i32, %c0_i32_0 : i32, i32
  }
  func.func @transform_5(%arg0: i32) -> (i32, i32) {
    %c0_i32 = arith.constant 0 : i32
    %c0_i32_0 = arith.constant 0 : i32
    return %c0_i32, %arg0 : i32, i32
  }
}

</mosaic_0001>

<bundles_post_ra>
// kernel: tpu_custom_call.1
= control target key start
LH: loop header
LB: loop body
LE: loop exit
PB: predicated region body
PF: predicated region fallthrough
CT: control target
= control target key end

     0   :  { %s2396_s0 = inlined_call_operand.vmem [shape: bf16[256,64], index: 0, kind: input, shape index: {}]   ;;  %s2397_s1 = inlined_call_operand.vmem [shape: bf16[64,256], index: 1, kind: input, shape index: {}]   ;;  %s2398_s2 = inlined_call_operand.vmem [shape: f32[256,1], index: 2, kind: input, shape index: {}]   ;;  %s2399_s3 = inlined_call_operand.vmem [shape: f32[256,1], index: 3, kind: input, shape index: {}]   ;;  %s2400_s4 = inlined_call_operand.<no memory space> [shape: f32[1,1], index: 4, kind: input, shape index: {}]   ;;  %s2401_s5 = inlined_call_operand.hbm [shape: f32[2,256], index: 5, kind: output, shape index: {}]  }
   0x1   :  { %10 = sst [smem:[#allocation2]] %s2400_s4 }
   0x2   :  { %11 = vsyncpa [#allocation4], 0 }
   0x3   :  { %13 = vsyncpa [#allocation4 + $0x1], 0  ;;  %s1760_s20 = smov 0   ;;  %s1762_s21 = smov 0  }
   0x4   :  { %s1764_s22 = smov 0   ;;  %s1766_s23 = smov 0  }
   0x5 LB: > { %s1781_s4 = sadd.s32 4294967295, %s1723_s23   ;;  %s1326_s24 = sadd.s32 4294967294, %s1723_s23   ;;  %s1723_s23 = sphi %s1766_s23, %s2443_s23   ;;  %s1719_s22 = sphi %s1764_s22, %s2442_s22   ;;  %s1715_s21 = sphi %s1762_s21, %s2441_s21   ;;  %s1711_s20 = sphi %s1760_s20, %s2440_s20  }
   0x6   : > { %s1785_s25 = sadd.s32 1, %s1723_s23   ;;  %s136_s26 = sadd.s32 1, %s1719_s22 }
   0x7   : > { %s133_s27 = ssub.s32 %s1723_s23, %s1785_s25  ;;  %p146_p0 = scmp.ne.s32.totalorder %s1719_s22, %s1715_s21 }
   0x8   : > { %p134_p1 = scmp.eq.s32.totalorder %s133_s27, 0  ;;  %p147_p2 = scmp.eq.s32.totalorder %s1781_s4, 1 }
   0x9   : > { %p152_p3 = scmp.ne.s32.totalorder %s1715_s21, %s1711_s20  ;;  %p153_p4 = scmp.eq.s32.totalorder %s1326_s24, 1 }
   0xa   : > { %s1796_s28 = scalar_select %p134_p1, %s1719_s22, %s136_s26  }
   0xb   : > { %p1798_p5 = por %p147_p2, %p146_p0  ;;  %p1802_p6 = por %p153_p4, %p152_p3 }
   0xc   : > { %p1329_p7 = scmp.ge.s32.totalorder %s1723_s23, 1  ;;  %p192_p8 = scmp.lt.s32.totalorder %s1723_s23, 3 }
   0xe   : > { %p193_p9 = pnand %p1329_p7, %p192_p8 }
  0x10   : > { %196 = sbr.rel (%p193_p9) target bundleno = 439 (0x1b7), region = 40 }
  0x15   : > { %v1515_v0 = vld [vmem:[%s2397_s1 + $0x4] ss:$8 sps:$4 sm:$0xff]   ;;  %s1331_s8 = sshll.u32 %s1781_s4, 4  ;;  %v1517_v1 = vld [vmem:[%s2397_s1] ss:$8 sps:$4 sm:$0xff]   ;;  %vm555_vm0 = vcmask 523264  }
  0x16   : > { %p221_p10 = scmp.lt.s32.totalorder %s1331_s8, 31  ;;  %499 = vxpose.xlu1.c.b16.start [1/4] (short) %v1515_v0, 128  ;;  %v1518_v2 = vld [vmem:[%s2397_s1 + $0x14] ss:$8 sps:$4 sm:$0xff]   ;;  %483 = vxpose.xlu0.c.b16.start [1/4] (short) %v1517_v1, 128  ;;  %v1520_v3 = vld [vmem:[%s2397_s1 + $0x10] ss:$8 sps:$4 sm:$0xff]   ;;  %v1725_v13 = vmov 0  }
  0x17   : > { %v1521_v4 = vld [vmem:[%s2397_s1 + $0x24] ss:$8 sps:$4 sm:$0xff]   ;;  %v1523_v5 = vld [vmem:[%s2397_s1 + $0x20] ss:$8 sps:$4 sm:$0xff]   ;;  %v1524_v9 = vld [vmem:[%s2397_s1 + $0x34] ss:$8 sps:$4 sm:$0xff]  }
  0x18   : > { %s2445_s8 = smov (!%p221_p10, %s1331_s8), 31  ;;  %v1526_v10 = vld [vmem:[%s2397_s1 + $0x30] ss:$8 sps:$4 sm:$0xff]   ;;  %v252_v16 = vld [vmem:[%s2398_s2 + $0x8] sm:$0xff]  ;;  %v251_v20 = vld [vmem:[%s2398_s2] sm:$0xff]  ;;  %s217_s24 = sand.u32 1, %s1715_s21  }
  0x19   : > { %s1332_s15 = sshll.u32 %s2445_s8, 2  ;;  %v253_v19 = vld [vmem:[%s2398_s2 + $0x10] sm:$0xff]  ;;  %v254_v21 = vld [vmem:[%s2398_s2 + $0x18] sm:$0xff]  ;;  %v255_v24 = vld [vmem:[%s2398_s2 + $0x20] sm:$0xff]  ;;  %s1249_s26 = sld [smem:[#allocation2]]  ;;  %vm1247_vm1 = vcmask 1040384  }
  0x1a   : > { %500 = vxpose.xlu1.c.b16.cont [2/4] (short) %v1518_v2, 128  ;;  %s1830_s27 = scalar_lea.vmem %s2396_s0, %s1332_s15  ;;  %484 = vxpose.xlu0.c.b16.cont [2/4] (short) %v1520_v3, 128  ;;  %v256_v25 = vld [vmem:[%s2398_s2 + $0x28] sm:$0xff]  ;;  %v257_v26 = vld [vmem:[%s2398_s2 + $0x30] sm:$0xff]  ;;  %v258_v27 = vld [vmem:[%s2398_s2 + $0x38] sm:$0xff]  ;;  %s1330_s6 = sshll.u32 %s217_s24, 1 }
  0x1b   : > { %v1527_v6 = vld [vmem:[%s1830_s27 + $0x38] sm:$0xff]   ;;  %v1528_v8 = vld [vmem:[%s1830_s27 + $0x30] sm:$0xff]   ;;  %v1529_v12 = vld [vmem:[%s1830_s27 + $0x28] sm:$0xff]   ;;  %s1366_s7 = sshll.u32 %s1781_s4, 5  ;;  %s1254_s12 = scalar_lea.sflag [#allocation4], %s217_s24 }
  0x1c   : > { %1457 = vmatprep.subr.msk.bf16.mxu0 %vm555_vm0, %v1527_v6  ;;  %1458 = vmatprep.subr.msk.bf16.mxu1 %vm555_vm0, %v1527_v6  ;;  %v626_v7 = vsel %vm555_vm0, %v1527_v6, 0  ;;  %v623_v11 = vsel %vm555_vm0, %v1528_v8, 0  ;;  %v620_v14 = vsel %vm555_vm0, %v1529_v12, 0  ;;  %v1530_v15 = vld [vmem:[%s1830_s27 + $0x20] sm:$0xff]   ;;  %v1531_v18 = vld [vmem:[%s1830_s27 + $0x18] sm:$0xff]   ;;  %v1532_v23 = vld [vmem:[%s1830_s27 + $0x10] sm:$0xff]   ;;  %s1265_s11 = scalar_lea.hbm %s2401_s5, %s1366_s7 }
  0x1d   : > { %1394 = vmatpush3.bf16.xpose.msra.mxu0 %v626_v7  ;;  %1449 = vmatpush3.bf16.xpose.msra.mxu1 %v626_v7  ;;  %v617_v17 = vsel %vm555_vm0, %v1530_v15, 0  ;;  %v614_v22 = vsel %vm555_vm0, %v1531_v18, 0  ;;  %v611_v28 = vsel %vm555_vm0, %v1532_v23, 0  ;;  %v1533_v29 = vld [vmem:[%s1830_s27 + $0x8] sm:$0xff]   ;;  %v259_v30 = vld [vmem:[%s2398_s2 + $0x40] sm:$0xff]  ;;  %v261_v32 = vld [vmem:[%s2398_s2 + $0x50] sm:$0xff] }
  0x1e   : > { %501 = vxpose.xlu1.c.b16.cont [3/4] (short) %v1521_v4, 128  ;;  %485 = vxpose.xlu0.c.b16.cont [3/4] (short) %v1523_v5, 128  ;;  %v260_v31 = vld [vmem:[%s2398_s2 + $0x48] sm:$0xff]  ;;  %v262_v33 = vld [vmem:[%s2398_s2 + $0x58] sm:$0xff]  ;;  %v608_v34 = vsel %vm555_vm0, %v1533_v29, 0  ;;  %v1534_v35 = vld [vmem:[%s1830_s27] sm:$0xff]   ;;  %s219_s27 = scalar_lea.vmem [#allocation3], %s1330_s6  ;;  %s1726_s14 = smov [#allocation3]  }
  0x1f   : > { %1459 = vmatprep.subr.msk.bf16.mxu0 %vm555_vm0, %v1528_v8  ;;  %1460 = vmatprep.subr.msk.bf16.mxu1 %vm555_vm0, %v1528_v8  ;;  %v263_v36 = vld [vmem:[%s2398_s2 + $0x60] sm:$0xff]  ;;  %v264_v37 = vld [vmem:[%s2398_s2 + $0x68] sm:$0xff]  ;;  %v265_v38 = vld [vmem:[%s2398_s2 + $0x70] sm:$0xff]  ;;  %v605_v40 = vsel %vm555_vm0, %v1534_v35, 0  ;;  %s1267_s8 = sshll.u32 %s219_s27, 4  ;;  %s1667_s15 = sshll.u32 %s1726_s14, 4  ;;  %s1268_s8 = int_to_ptr.vmem [resolvable:$true] %s1267_s8  ;;  %s1668_s15 = int_to_ptr.vmem [resolvable:$false] %s1667_s15 }
  0x20   : > { %v266_v39 = vld [vmem:[%s2398_s2 + $0x78] sm:$0xff]  ;;  %v267_v41 = vld [vmem:[%s2398_s2 + $0x80] sm:$0xff]  ;;  %v268_v42 = vld [vmem:[%s2398_s2 + $0x88] sm:$0xff]  ;;  %s1663_s13 = scalar_lea.vmem %s1268_s8, 32  ;;  %s1669_s4 = scalar_lea.vmem %s1668_s15, 64 }
  0x21   : > { %v269_v43 = vld [vmem:[%s2398_s2 + $0x90] sm:$0xff]  ;;  %v270_v44 = vld [vmem:[%s2398_s2 + $0x98] sm:$0xff]  ;;  %v271_v45 = vld [vmem:[%s2398_s2 + $0xa0] sm:$0xff]  ;;  %p1664_p11 = scmp.ne.s32.totalorder %s1268_s8, %s1663_s13  ;;  %p1670_p0 = scmp.lt.s32.totalorder %s1268_s8, %s1668_s15 }
  0x22   : > { %502 = vxpose.xlu1.c.b16.end [4/4] (short) %v1524_v9, 128  ;;  %486 = vxpose.xlu0.c.b16.end [4/4] (short) %v1526_v10, 128  ;;  %v272_v46 = vld [vmem:[%s2398_s2 + $0xa8] sm:$0xff]  ;;  %v273_v47 = vld [vmem:[%s2398_s2 + $0xb0] sm:$0xff]  ;;  %v274_v48 = vld [vmem:[%s2398_s2 + $0xb8] sm:$0xff]  ;;  %p1671_p1 = scmp.lt.s32.totalorder %s1669_s4, %s1663_s13 }
  0x23   : > { %v275_v49 = vld [vmem:[%s2398_s2 + $0xc0] sm:$0xff]  ;;  %v276_v50 = vld [vmem:[%s2398_s2 + $0xc8] sm:$0xff]  ;;  %v277_v51 = vld [vmem:[%s2398_s2 + $0xd0] sm:$0xff]  ;;  %p1665_p12 = pnand %p1664_p11, %p1798_p5 }
  0x24   : > { %v278_v52 = vld [vmem:[%s2398_s2 + $0xd8] sm:$0xff]  ;;  %v279_v53 = vld [vmem:[%s2398_s2 + $0xe0] sm:$0xff]  ;;  %v280_v54 = vld [vmem:[%s2398_s2 + $0xe8] sm:$0xff]  ;;  %p1672_p2 = por %p1671_p1, %p1670_p0 }
  0x25   : > { %1396 = vmatpush3.bf16.xpose.msra.mxu0 %v623_v11  ;;  %1450 = vmatpush3.bf16.xpose.msra.mxu1 %v623_v11  ;;  %v281_v55 = vld [vmem:[%s2398_s2 + $0xf0] sm:$0xff]  ;;  %v282_v56 = vld [vmem:[%s2398_s2 + $0xf8] sm:$0xff]  ;;  %v981_v57 = vld [vmem:[%s2399_s3] sm:$0xff]  ;;  %p1666_p13 = pneg %p1665_p12 }
  0x26   : > { %1514 = vset.pattern.permute.xlu1 %v1725_v13  ;;  %1461 = vmatprep.subr.msk.bf16.mxu0 %vm555_vm0, %v1529_v12  ;;  %v982_v58 = vld [vmem:[%s2399_s3 + $0x8] sm:$0xff]  ;;  %v983_v61 = vld [vmem:[%s2399_s3 + $0x10] sm:$0xff]  ;;  %v984_v62 = vld [vmem:[%s2399_s3 + $0x18] sm:$0xff] }
  0x27   : > { %1462 = vmatprep.subr.msk.bf16.mxu1 %vm555_vm0, %v1529_v12  ;;  %v985_v1 = vld [vmem:[%s2399_s3 + $0x20] sm:$0xff]  ;;  %v986_v2 = vld [vmem:[%s2399_s3 + $0x28] sm:$0xff]  ;;  %v987_v5 = vld [vmem:[%s2399_s3 + $0x30] sm:$0xff]  ;;  %p1673_p3 = pnand %p1672_p2, %p1666_p13 }
  0x28   : > { %v997_v6 = vld [vmem:[%s2399_s3 + $0x80] sm:$0xff]  ;;  %v998_v9 = vld [vmem:[%s2399_s3 + $0x88] sm:$0xff]  ;;  %v999_v10 = vld [vmem:[%s2399_s3 + $0x90] sm:$0xff] }
  0x2b   : > { %1513 = vset.pattern.permute.xlu0 %v1725_v13  ;;  %v1000_v13 = vld [vmem:[%s2399_s3 + $0x98] sm:$0xff] }
  0x2d   : > { %1398 = vmatpush3.bf16.xpose.msra.mxu0 %v620_v14  ;;  %1451 = vmatpush3.bf16.xpose.msra.mxu1 %v620_v14  ;;  %v1001_v14 = vld [vmem:[%s2399_s3 + $0xa0] sm:$0xff] }
  0x2e   : > { %1463 = vmatprep.subr.msk.bf16.mxu0 %vm555_vm0, %v1530_v15  ;;  %1464 = vmatprep.subr.msk.bf16.mxu1 %vm555_vm0, %v1530_v15 }
  0x35   : > { %1400 = vmatpush3.bf16.xpose.msra.mxu0 %v617_v17  ;;  %1452 = vmatpush3.bf16.xpose.msra.mxu1 %v617_v17  ;;  %v1002_v17 = vld [vmem:[%s2399_s3 + $0xa8] sm:$0xff] }
  0x36   : > { %290 = vperm.xlu1 %1514, %v252_v16   ;;  %1465 = vmatprep.subr.msk.bf16.mxu0 %vm555_vm0, %v1531_v18 }
  0x37   : > { %1466 = vmatprep.subr.msk.bf16.mxu1 %vm555_vm0, %v1531_v18  ;;  %v1003_v18 = vld [vmem:[%s2399_s3 + $0xb0] sm:$0xff] }
  0x3a   : > { %295 = vperm.xlu1 %1514, %v253_v19  }
  0x3b   : > { %285 = vperm.xlu0 %1513, %v251_v20  }
  0x3d   : > { %1402 = vmatpush3.bf16.xpose.msra.mxu0 %v614_v22  ;;  %1453 = vmatpush3.bf16.xpose.msra.mxu1 %v614_v22  ;;  %v1004_v22 = vld [vmem:[%s2399_s3 + $0xb8] sm:$0xff] }
  0x3e   : > { %300 = vperm.xlu1 %1514, %v254_v21   ;;  %1467 = vmatprep.subr.msk.bf16.mxu0 %vm555_vm0, %v1532_v23  ;;  %v988_v21 = vld [vmem:[%s2399_s3 + $0x38] sm:$0xff] }
  0x3f   : > { %305 = vperm.xlu0 %1513, %v255_v24   ;;  %1468 = vmatprep.subr.msk.bf16.mxu1 %vm555_vm0, %v1532_v23 }
  0x42   : > { %310 = vperm.xlu1 %1514, %v256_v25   ;;  %v989_v25 = vld [vmem:[%s2399_s3 + $0x40] sm:$0xff] }
  0x43   : > { %315 = vperm.xlu0 %1513, %v257_v26   ;;  %v1005_v26 = vld [vmem:[%s2399_s3 + $0xc0] sm:$0xff] }
  0x45   : > { %1404 = vmatpush3.bf16.xpose.msra.mxu0 %v611_v28  ;;  %1454 = vmatpush3.bf16.xpose.msra.mxu1 %v611_v28  ;;  %v1006_v28 = vld [vmem:[%s2399_s3 + $0xc8] sm:$0xff] }
  0x46   : > { %320 = vperm.xlu1 %1514, %v258_v27   ;;  %1469 = vmatprep.subr.msk.bf16.mxu0 %vm555_vm0, %v1533_v29  ;;  %v990_v27 = vld [vmem:[%s2399_s3 + $0x48] sm:$0xff] }
  0x47   : > { %325 = vperm.xlu0 %1513, %v259_v30   ;;  %1470 = vmatprep.subr.msk.bf16.mxu1 %vm555_vm0, %v1533_v29  ;;  %v991_v29 = vld [vmem:[%s2399_s3 + $0x50] sm:$0xff] }
  0x48   : > { %v1007_v30 = vld [vmem:[%s2399_s3 + $0xd0] sm:$0xff] }
  0x4a   : > { %330 = vperm.xlu1 %1514, %v260_v31   ;;  %v992_v31 = vld [vmem:[%s2399_s3 + $0x58] sm:$0xff] }
  0x4b   : > { %335 = vperm.xlu0 %1513, %v261_v32   ;;  %v1008_v32 = vld [vmem:[%s2399_s3 + $0xd8] sm:$0xff] }
  0x4d   : > { %1406 = vmatpush3.bf16.xpose.msra.mxu0 %v608_v34  ;;  %1455 = vmatpush3.bf16.xpose.msra.mxu1 %v608_v34  ;;  %v1009_v34 = vld [vmem:[%s2399_s3 + $0xe0] sm:$0xff] }
  0x4e   : > { %340 = vperm.xlu1 %1514, %v262_v33   ;;  %1471 = vmatprep.subr.msk.bf16.mxu0 %vm555_vm0, %v1534_v35  ;;  %v993_v33 = vld [vmem:[%s2399_s3 + $0x60] sm:$0xff] }
  0x4f   : > { %345 = vperm.xlu0 %1513, %v263_v36   ;;  %1472 = vmatprep.subr.msk.bf16.mxu1 %vm555_vm0, %v1534_v35  ;;  %v994_v35 = vld [vmem:[%s2399_s3 + $0x68] sm:$0xff] }
  0x50   : > { %v1010_v36 = vld [vmem:[%s2399_s3 + $0xe8] sm:$0xff] }
  0x52   : > { %350 = vperm.xlu1 %1514, %v264_v37   ;;  %v995_v37 = vld [vmem:[%s2399_s3 + $0x70] sm:$0xff] }
  0x53   : > { %355 = vperm.xlu0 %1513, %v265_v38   ;;  %v1011_v38 = vld [vmem:[%s2399_s3 + $0xf0] sm:$0xff] }
  0x55   : > { %1408 = vmatpush3.bf16.xpose.msra.mxu0 %v605_v40  ;;  %1456 = vmatpush3.bf16.xpose.msra.mxu1 %v605_v40  ;;  %v1012_v40 = vld [vmem:[%s2399_s3 + $0xf8] sm:$0xff] }
  0x56   : > { %360 = vperm.xlu1 %1514, %v266_v39   ;;  %v996_v39 = vld [vmem:[%s2399_s3 + $0x78] sm:$0xff] }
  0x57   : > { %365 = vperm.xlu0 %1513, %v267_v41  }
  0x5a   : > { %370 = vperm.xlu1 %1514, %v268_v42  }
  0x5b   : > { %375 = vperm.xlu0 %1513, %v269_v43  }
  0x5e   : > { %380 = vperm.xlu1 %1514, %v270_v44  }
  0x5f   : > { %385 = vperm.xlu0 %1513, %v271_v45  }
  0x62   : > { %390 = vperm.xlu1 %1514, %v272_v46  }
  0x63   : > { %395 = vperm.xlu0 %1513, %v273_v47  }
  0x66   : > { %400 = vperm.xlu1 %1514, %v274_v48  }
  0x67   : > { %405 = vperm.xlu0 %1513, %v275_v49  }
  0x6a   : > { %410 = vperm.xlu1 %1514, %v276_v50  }
  0x6b   : > { %415 = vperm.xlu0 %1513, %v277_v51  }
  0x6e   : > { %420 = vperm.xlu1 %1514, %v278_v52  }
  0x6f   : > { %425 = vperm.xlu0 %1513, %v279_v53  }
  0x72   : > { %430 = vperm.xlu1 %1514, %v280_v54  }
  0x73   : > { %435 = vperm.xlu0 %1513, %v281_v55  }
  0x76   : > { %440 = vperm.xlu1 %1514, %v282_v56  }
  0x77   : > { %1015 = vperm.xlu0 %1513, %v981_v57  }
  0x78   : > { %v507_v59 = vpop.trf.xlu1  ;;  %v491_v60 = vpop.trf.xlu0 }
  0x79   : > { %1425 = vmatprep.mubr.msk.bf16.mxu1 %vm555_vm0, %v507_v59  ;;  %1409 = vmatprep.mubr.msk.bf16.mxu0 %vm555_vm0, %v491_v60 }
  0x7a   : > { %1020 = vperm.xlu1 %1514, %v982_v58  }
  0x7b   : > { %1025 = vperm.xlu0 %1513, %v983_v61  }
  0x7c   : > { %v508_v63 = vpop.trf.xlu1  ;;  %v492_v0 = vpop.trf.xlu0 }
  0x7d   : > { %1426 = vmatmul.mubr.msk.bf16.vlgmr.msra.gmra.mxu1 %vm555_vm0, %v508_v63  ;;  %1410 = vmatmul.mubr.msk.bf16.vlgmr.msra.gmra.mxu0 %vm555_vm0, %v492_v0 }
  0x7e   : > { %1030 = vperm.xlu1 %1514, %v984_v62  }
  0x7f   : > { %1035 = vperm.xlu0 %1513, %v985_v1  }
  0x80   : > { %v509_v3 = vpop.trf.xlu1  ;;  %v493_v4 = vpop.trf.xlu0 }
  0x81   : > { %1429 = vmatprep.mubr.msk.bf16.mxu1 %vm555_vm0, %v509_v3  ;;  %1413 = vmatprep.mubr.msk.bf16.mxu0 %vm555_vm0, %v493_v4 }
  0x82   : > { %1040 = vperm.xlu1 %1514, %v986_v2  }
  0x83   : > { %1045 = vperm.xlu0 %1513, %v987_v5  }
  0x84   : > { %v510_v7 = vpop.trf.xlu1  ;;  %v494_v8 = vpop.trf.xlu0 }
  0x85   : > { %1430 = vmatmul.mubr.msk.bf16.gmra.mxu1 %vm555_vm0, %v510_v7  ;;  %1414 = vmatmul.mubr.msk.bf16.gmra.mxu0 %vm555_vm0, %v494_v8 }
  0x86   : > { %1095 = vperm.xlu1 %1514, %v997_v6  }
  0x87   : > { %1100 = vperm.xlu0 %1513, %v998_v9  }
  0x88   : > { %v511_v11 = vpop.trf.xlu1  ;;  %v495_v12 = vpop.trf.xlu0 }
  0x89   : > { %1433 = vmatprep.mubr.msk.bf16.mxu1 %vm555_vm0, %v511_v11  ;;  %1417 = vmatprep.mubr.msk.bf16.mxu0 %vm555_vm0, %v495_v12 }
  0x8a   : > { %1105 = vperm.xlu1 %1514, %v999_v10  }
  0x8b   : > { %1110 = vperm.xlu0 %1513, %v1000_v13  }
  0x8c   : > { %v512_v15 = vpop.trf.xlu1  ;;  %v496_v16 = vpop.trf.xlu0 }
  0x8d   : > { %1434 = vmatmul.mubr.msk.bf16.gmra.mxu1 %vm555_vm0, %v512_v15  ;;  %1418 = vmatmul.mubr.msk.bf16.gmra.mxu0 %vm555_vm0, %v496_v16 }
  0x8e   : > { %1115 = vperm.xlu1 %1514, %v1001_v14  }
  0x8f   : > { %1120 = vperm.xlu0 %1513, %v1002_v17  }
  0x90   : > { %v513_v19 = vpop.trf.xlu1  ;;  %v497_v20 = vpop.trf.xlu0 }
  0x91   : > { %1437 = vmatprep.mubr.msk.bf16.mxu1 %vm555_vm0, %v513_v19  ;;  %1421 = vmatprep.mubr.msk.bf16.mxu0 %vm555_vm0, %v497_v20 }
  0x92   : > { %1125 = vperm.xlu1 %1514, %v1003_v18  }
  0x93   : > { %1050 = vperm.xlu0 %1513, %v988_v21  }
  0x94   : > { %v514_v23 = vpop.trf.xlu1  ;;  %v498_v24 = vpop.trf.xlu0 }
  0x95   : > { %1438 = vmatmul.mubr.msk.bf16.gmra.mxu1 %vm555_vm0, %v514_v23  ;;  %1422 = vmatmul.mubr.msk.bf16.gmra.mxu0 %vm555_vm0, %v498_v24 }
  0x96   : > { %1130 = vperm.xlu1 %1514, %v1004_v22  }
  0x97   : > { %1055 = vperm.xlu0 %1513, %v989_v25  }
  0x9a   : > { %1135 = vperm.xlu1 %1514, %v1005_v26  }
  0x9b   : > { %1060 = vperm.xlu0 %1513, %v990_v27  }
  0x9e   : > { %1140 = vperm.xlu1 %1514, %v1006_v28  }
  0x9f   : > { %1065 = vperm.xlu0 %1513, %v991_v29  }
  0xa2   : > { %1145 = vperm.xlu1 %1514, %v1007_v30  }
  0xa3   : > { %1070 = vperm.xlu0 %1513, %v992_v31  }
  0xa6   : > { %1150 = vperm.xlu1 %1514, %v1008_v32  }
  0xa7   : > { %1075 = vperm.xlu0 %1513, %v993_v33  }
  0xaa   : > { %1155 = vperm.xlu1 %1514, %v1009_v34  }
  0xab   : > { %1080 = vperm.xlu0 %1513, %v994_v35  }
  0xae   : > { %1160 = vperm.xlu1 %1514, %v1010_v36  }
  0xaf   : > { %1085 = vperm.xlu0 %1513, %v995_v37  }
  0xb1   : > { %v2078_v41 = vpop.permute.xlu1 %290 }
  0xb2   : > { %1165 = vperm.xlu1 %1514, %v1011_v38  }
  0xb3   : > { %1090 = vperm.xlu0 %1513, %v996_v39  }
  0xb5   : > { %v296_v42 = vpop.permute.xlu1 %295 }
  0xb6   : > { %1170 = vperm.xlu1 %1514, %v1012_v40   ;;  %v286_v43 = vpop.permute.xlu0 %285 }
  0xb9   : > { %v301_v44 = vpop.permute.xlu1 %300 }
  0xba   : > { %v2080_v45 = vpop.permute.xlu0 %305 }
  0xbd   : > { %v2082_v46 = vpop.permute.xlu1 %310 }
  0xbe   : > { %v2084_v47 = vpop.permute.xlu0 %315 }
  0xc1   : > { %v2086_v48 = vpop.permute.xlu1 %320 }
  0xc2   : > { %v2088_v49 = vpop.permute.xlu0 %325 }
  0xc5   : > { %v2090_v50 = vpop.permute.xlu1 %330 }
  0xc6   : > { %v2092_v51 = vpop.permute.xlu0 %335 }
  0xc9   : > { %v2094_v52 = vpop.permute.xlu1 %340 }
  0xca   : > { %v2096_v53 = vpop.permute.xlu0 %345 }
  0xcd   : > { %v2098_v54 = vpop.permute.xlu1 %350 }
  0xce   : > { %v2100_v55 = vpop.permute.xlu0 %355 }
  0xd1   : > { %v2102_v56 = vpop.permute.xlu1 %360 }
  0xd2   : > { %v366_v57 = vpop.permute.xlu0 %365 }
  0xd5   : > { %v371_v58 = vpop.permute.xlu1 %370 }
  0xd6   : > { %v376_v59 = vpop.permute.xlu0 %375 }
  0xd9   : > { %v381_v60 = vpop.permute.xlu1 %380 }
  0xda   : > { %v386_v61 = vpop.permute.xlu0 %385 }
  0xdd   : > { %v2104_v62 = vpop.permute.xlu1 %390 }
  0xde   : > { %v396_v63 = vpop.permute.xlu0 %395 }
  0xe1   : > { %v2106_v0 = vpop.permute.xlu1 %400 }
  0xe2   : > { %v2108_v1 = vpop.permute.xlu0 %405 }
  0xe5   : > { %v2110_v2 = vpop.permute.xlu1 %410 }
  0xe6   : > { %v2112_v3 = vpop.permute.xlu0 %415 }
  0xe9   : > { %v2114_v4 = vpop.permute.xlu1 %420 }
  0xea   : > { %v2116_v5 = vpop.permute.xlu0 %425 }
  0xed   : > { %v2118_v6 = vpop.permute.xlu1 %430 }
  0xee   : > { %v2120_v7 = vpop.permute.xlu0 %435 }
  0xf1   : > { %v2122_v8 = vpop.permute.xlu1 %440 }
  0xf2   : > { %v2124_v9 = vpop.permute.xlu0 %1015 }
  0xf5   : > { %v2126_v10 = vpop.permute.xlu1 %1020 }
  0xf6   : > { %v2132_v16 = vpop.permute.xlu0 %1025 }
  0xf9   : > { %v2137_v20 = vpop.permute.xlu1 %1030 }
  0xfa   : > { %v2155_v40 = vpop.permute.xlu0 %1035 }
 0x13d   : > { %v1427_v11 = vpop.f32.mrf.mxu1  ;;  %v1411_v12 = vpop.f32.mrf.mxu0 }
 0x13e   : > { %v2128_v13 = vadd.f32 %v1427_v11, %v376_v59  ;;  %v2130_v14 = vadd.f32 %v1411_v12, %v296_v42  ;;  %v2160_v59 = vpop.permute.xlu1 %1040 }
 0x13f   : > { %v726_v15 = vpop.f32.mrf.mxu1  ;;  %v662_v18 = vpop.f32.mrf.mxu0 }
 0x140   : > { %v807_v17 = vsub.f32 0.0, %v2128_v13  ;;  %v2135_v19 = vadd.f32 %v726_v15, %v366_v57  ;;  %v791_v21 = vsub.f32 0.0, %v2130_v14  ;;  %v2140_v22 = vadd.f32 %v662_v18, %v286_v43 }
 0x141   : > { %v1428_v23 = vpop.f32.mrf.mxu1  ;;  %v1412_v26 = vpop.f32.mrf.mxu0 }
 0x142   : > { %v857_v24 = vmul.f32 1.442695, %v807_v17  ;;  %v805_v25 = vsub.f32 0.0, %v2135_v19  ;;  %v2143_v27 = vadd.f32 %v1428_v23, %v381_v60  ;;  %v825_v28 = vmul.f32 1.442695, %v791_v21 }
 0x143   : > { %v789_v29 = vsub.f32 0.0, %v2140_v22  ;;  %v2146_v30 = vadd.f32 %v1412_v26, %v301_v44  ;;  %v729_v31 = vpop.f32.mrf.mxu1  ;;  %v665_v34 = vpop.f32.mrf.mxu0 }
 0x144   : > { %1535 = vpow2.f32 %v857_v24  ;;  %v853_v32 = vmul.f32 1.442695, %v805_v25  ;;  %v808_v33 = vsub.f32 0.0, %v2143_v27  ;;  %v2149_v35 = vadd.f32 %v729_v31, %v371_v58 }
 0x145   : > { %1537 = vpow2.f32 %v825_v28  ;;  %v821_v36 = vmul.f32 1.442695, %v789_v29  ;;  %v792_v37 = vsub.f32 0.0, %v2146_v30  ;;  %v2153_v38 = vadd.f32 %v665_v34, %v2078_v41  ;;  %v1431_v39 = vpop.f32.mrf.mxu1  ;;  %v1415_v44 = vpop.f32.mrf.mxu0 }
 0x146   : > { %1539 = vpow2.f32 %v853_v32  ;;  %v859_v42 = vmul.f32 1.442695, %v808_v33  ;;  %v806_v43 = vsub.f32 0.0, %v2149_v35  ;;  %v2158_v57 = vadd.f32 %v1431_v39, %v396_v63  ;;  %v2181_v33 = vpop.permute.xlu0 %1045 }
 0x147   : > { %1541 = vpow2.f32 %v821_v36  ;;  %v827_v58 = vmul.f32 1.442695, %v792_v37  ;;  %v790_v60 = vsub.f32 0.0, %v2153_v38  ;;  %v2164_v11 = vadd.f32 %v1415_v44, %v2084_v47  ;;  %v742_v41 = vpop.f32.mrf.mxu1  ;;  %v678_v17 = vpop.f32.mrf.mxu0 }
 0x148   : > { %1543 = vpow2.f32 %v859_v42  ;;  %v855_v12 = vmul.f32 1.442695, %v806_v43  ;;  %v811_v15 = vsub.f32 0.0, %v2158_v57  ;;  %v2167_v18 = vadd.f32 %v742_v41, %v386_v61 }
 0x149   : > { %1545 = vpow2.f32 %v827_v58  ;;  %v823_v63 = vmul.f32 1.442695, %v790_v60  ;;  %v795_v21 = vsub.f32 0.0, %v2164_v11  ;;  %v2171_v23 = vadd.f32 %v678_v17, %v2080_v45  ;;  %v1432_v24 = vpop.f32.mrf.mxu1  ;;  %v1416_v26 = vpop.f32.mrf.mxu0 }
 0x14a   : > { %1547 = vpow2.f32 %v855_v12  ;;  %v865_v25 = vmul.f32 1.442695, %v811_v15  ;;  %v809_v47 = vsub.f32 0.0, %v2167_v18  ;;  %v2175_v28 = vadd.f32 %v1432_v24, %v2106_v0  ;;  %v2187_v0 = vpop.permute.xlu1 %1095 }
 0x14b   : > { %1549 = vpow2.f32 %v823_v63  ;;  %v833_v29 = vmul.f32 1.442695, %v795_v21  ;;  %v793_v61 = vsub.f32 0.0, %v2171_v23  ;;  %v2179_v31 = vadd.f32 %v1416_v26, %v2086_v48  ;;  %v745_v32 = vpop.f32.mrf.mxu1  ;;  %v681_v36 = vpop.f32.mrf.mxu0 }
 0x14c   : > { %2416 = vst [vmem:[#allocation6_spill] sm:$0xff] %v2175_v28  ;;  %1551 = vpow2.f32 %v865_v25  ;;  %v861_v45 = vmul.f32 1.442695, %v809_v47  ;;  %v812_v34 = vsub.f32 0.0, %v2175_v28  ;;  %v2185_v37 = vadd.f32 %v745_v32, %v2104_v62  ;;  %v2201_v32 = vpop.permute.xlu0 %1100 }
 0x14d   : > { %1553 = vpow2.f32 %v833_v29  ;;  %v829_v39 = vmul.f32 1.442695, %v793_v61  ;;  %v796_v42 = vsub.f32 0.0, %v2179_v31  ;;  %v2191_v48 = vadd.f32 %v681_v36, %v2082_v46  ;;  %v1435_v43 = vpop.f32.mrf.mxu1  ;;  %v1419_v60 = vpop.f32.mrf.mxu0 }
 0x14e   : > { %1555 = vpow2.f32 %v861_v45  ;;  %v867_v44 = vmul.f32 1.442695, %v812_v34  ;;  %v810_v58 = vsub.f32 0.0, %v2185_v37  ;;  %v2196_v46 = vadd.f32 %v1435_v43, %v2112_v3  ;;  %v2203_v45 = vpop.permute.xlu1 %1105 }
 0x14f   : > { %1557 = vpow2.f32 %v829_v39  ;;  %v835_v41 = vmul.f32 1.442695, %v796_v42  ;;  %v794_v62 = vsub.f32 0.0, %v2191_v48  ;;  %v758_v12 = vpop.f32.mrf.mxu1  ;;  %v694_v17 = vpop.f32.mrf.mxu0  ;;  %v2199_v26 = vadd.f32 %v1419_v60, %v2092_v51 }
 0x150   : > { %1559 = vpow2.f32 %v867_v44  ;;  %v863_v15 = vmul.f32 1.442695, %v810_v58  ;;  %2417 = vst [vmem:[#allocation7_spill] sm:$0xff] %v2196_v46  ;;  %v815_v58 = vsub.f32 0.0, %v2196_v46  ;;  %v2207_v51 = vadd.f32 %v758_v12, %v2108_v1  ;;  %v2213_v46 = vpop.permute.xlu0 %1110 }
 0x151   : > { %v1536_v63 = vpop.eup %1535  ;;  %1561 = vpow2.f32 %v835_v41  ;;  %v831_v21 = vmul.f32 1.442695, %v794_v62  ;;  %v1436_v24 = vpop.f32.mrf.mxu1  ;;  %2418 = vst [vmem:[#allocation8_spill] sm:$0xff] %v2199_v26  ;;  %v799_v62 = vsub.f32 0.0, %v2199_v26 }
 0x152   : > { %v1538_v25 = vpop.eup %1537  ;;  %v903_v47 = vadd.f32 1.0, %v1536_v63  ;;  %1563 = vpow2.f32 %v863_v15  ;;  %v1420_v29 = vpop.f32.mrf.mxu0  ;;  %2419 = vst [vmem:[#allocation9_spill] sm:$0xff] %v2207_v51  ;;  %v2215_v12 = vmul.f32 1.442695, %v815_v58 }
 0x153   : > { %v1540_v61 = vpop.eup %1539  ;;  %v887_v34 = vadd.f32 1.0, %v1538_v25  ;;  %1565 = vpow2.f32 %v831_v21  ;;  %v761_v42 = vpop.f32.mrf.mxu1  ;;  %v2211_v21 = vadd.f32 %v694_v17, %v2088_v49  ;;  %v841_v17 = vmul.f32 1.442695, %v799_v62 }
 0x154   : > { %v1542_v36 = vpop.eup %1541  ;;  %1567 = vrcp.f32 %v903_v47  ;;  %v901_v39 = vadd.f32 1.0, %v1540_v61  ;;  %v697_v3 = vpop.f32.mrf.mxu0  ;;  %v2231_v62 = vadd.f32 %v761_v42, %v2110_v2 }
 0x155   : > { %v1544_v43 = vpop.eup %1543  ;;  %1569 = vrcp.f32 %v887_v34  ;;  %v885_v44 = vadd.f32 1.0, %v1542_v36  ;;  %2420 = vst [vmem:[#allocation10_spill] sm:$0xff] %v2211_v21  ;;  %v1439_v34 = vpop.f32.mrf.mxu1  ;;  %v797_v26 = vsub.f32 0.0, %v2211_v21  ;;  %v2228_v28 = vadd.f32 %v697_v3, %v2090_v50 }
 0x156   : > { %v1546_v60 = vpop.eup %1545  ;;  %1571 = vrcp.f32 %v901_v39  ;;  %v904_v41 = vadd.f32 1.0, %v1544_v43  ;;  %v1423_v25 = vpop.f32.mrf.mxu0  ;;  %v813_v39 = vsub.f32 0.0, %v2207_v51  ;;  %2424 = vst [vmem:[#allocation14_spill] sm:$0xff] %v2231_v62 }
 0x157   : > { %v1548_v15 = vpop.eup %1547  ;;  %1573 = vrcp.f32 %v885_v44  ;;  %v888_v63 = vadd.f32 1.0, %v1546_v60  ;;  %v2218_v44 = vpop.permute.xlu1 %1115  ;;  %v2221_v60 = vadd.f32 %v1420_v29, %v2094_v52  ;;  %2423 = vst [vmem:[#allocation13_spill] sm:$0xff] %v2228_v28 }
 0x158   : > { %v1550_v47 = vpop.eup %1549  ;;  %1575 = vrcp.f32 %v904_v41  ;;  %v902_v61 = vadd.f32 1.0, %v1548_v15  ;;  %v710_v58 = vpop.f32.mrf.mxu0 }
 0x159   : > { %v1552_v36 = vpop.eup %1551  ;;  %1577 = vrcp.f32 %v888_v63  ;;  %v886_v1 = vadd.f32 1.0, %v1550_v47  ;;  %2421 = vst [vmem:[#allocation11_spill] sm:$0xff] %v2221_v60  ;;  %v2225_v63 = vadd.f32 %v1436_v24, %v2114_v4  ;;  %v774_v52 = vpop.f32.mrf.mxu1  ;;  %v2237_v4 = vadd.f32 %v1439_v34, %v2120_v7 }
 0x15a   : > { %v1554_v43 = vpop.eup %1553  ;;  %1579 = vrcp.f32 %v902_v61  ;;  %v907_v49 = vadd.f32 1.0, %v1552_v36  ;;  %v2234_v36 = vadd.f32 %v1423_v25, %v2100_v55  ;;  %v2241_v50 = vadd.f32 %v710_v58, %v2096_v53  ;;  %v2243_v3 = vpop.permute.xlu0 %1120 }
 0x15b   : > { %v1556_v41 = vpop.eup %1555  ;;  %1581 = vrcp.f32 %v886_v1  ;;  %v891_v15 = vadd.f32 1.0, %v1554_v43  ;;  %2422 = vst [vmem:[#allocation12_spill] sm:$0xff] %v2225_v63  ;;  %2426 = vst [vmem:[#allocation16_spill] sm:$0xff] %v2237_v4  ;;  %v800_v43 = vsub.f32 0.0, %v2221_v60  ;;  %v2247_v55 = vadd.f32 %v774_v52, %v2116_v5  ;;  %v1424_v7 = vpop.f32.mrf.mxu0 }
 0x15c   : > { %v1558_v47 = vpop.eup %1557  ;;  %1583 = vrcp.f32 %v907_v49  ;;  %v905_v51 = vadd.f32 1.0, %v1556_v41  ;;  %2425 = vst [vmem:[#allocation15_spill] sm:$0xff] %v2234_v36  ;;  %v816_v49 = vsub.f32 0.0, %v2225_v63  ;;  %v2249_v34 = vpop.permute.xlu1 %1125  ;;  %v798_v41 = vsub.f32 0.0, %v2228_v28 }
 0x15d   : > { %v1560_v29 = vpop.eup %1559  ;;  %1585 = vrcp.f32 %v891_v15  ;;  %v889_v61 = vadd.f32 1.0, %v1558_v47  ;;  %2427 = vst [vmem:[#allocation17_spill] sm:$0xff] %v2247_v55  ;;  %v814_v53 = vsub.f32 0.0, %v2231_v62  ;;  %v1440_v15 = vpop.f32.mrf.mxu1  ;;  %v837_v52 = vmul.f32 1.442695, %v797_v26 }
 0x15e   : > { %v1562_v24 = vpop.eup %1561  ;;  %1587 = vrcp.f32 %v905_v51  ;;  %v908_v1 = vadd.f32 1.0, %v1560_v29  ;;  %v803_v29 = vsub.f32 0.0, %v2234_v36  ;;  %v801_v63 = vsub.f32 0.0, %v2241_v50  ;;  %v713_v28 = vpop.f32.mrf.mxu0 }
 0x15f   : > { %v1564_v2 = vpop.eup %1563  ;;  %1589 = vrcp.f32 %v889_v61  ;;  %v892_v42 = vadd.f32 1.0, %v1562_v24  ;;  %v819_v61 = vsub.f32 0.0, %v2237_v4  ;;  %v869_v24 = vmul.f32 1.442695, %v813_v39  ;;  %v777_v4 = vpop.f32.mrf.mxu1 }
 0x160   : > { %v1566_v25 = vpop.eup %1565  ;;  %1591 = vrcp.f32 %v908_v1  ;;  %v906_v51 = vadd.f32 1.0, %v1564_v2  ;;  %v843_v2 = vmul.f32 1.442695, %v800_v43  ;;  %v875_v60 = vmul.f32 1.442695, %v816_v49  ;;  %v2260_v26 = vpop.permute.xlu0 %1050 }
 0x161   : > { %v1568_v58 = vpop.eup %1567  ;;  %1593 = vrcp.f32 %v892_v42  ;;  %v890_v47 = vadd.f32 1.0, %v1566_v25  ;;  %v817_v62 = vsub.f32 0.0, %v2247_v55  ;;  %v839_v42 = vmul.f32 1.442695, %v798_v41  ;;  %v2266_v55 = vpop.permute.xlu1 %1130 }
 0x162   : > { %v1570_v5 = vpop.eup %1569  ;;  %1595 = vrcp.f32 %v906_v51  ;;  %v871_v25 = vmul.f32 1.442695, %v814_v53  ;;  %v2258_v36 = vadd.f32 %v1424_v7, %v2102_v56  ;;  %v849_v39 = vmul.f32 1.442695, %v803_v29 }
 0x163   : > { %v1572_v1 = vpop.eup %1571  ;;  %1597 = vrcp.f32 %v890_v47  ;;  %v881_v47 = vmul.f32 1.442695, %v819_v61  ;;  %v2264_v43 = vadd.f32 %v1440_v15, %v2122_v8  ;;  %v845_v41 = vmul.f32 1.442695, %v801_v63 }
 0x164   : > { %v1574_v21 = vpop.eup %1573  ;;  %1599 = vpow2.f32 %v841_v17  ;;  %v965_v17 = vmul.f32 %v1572_v1, %v2135_v19  ;;  %v2270_v56 = vadd.f32 %v713_v28, %v2098_v54  ;;  %v2274_v29 = vadd.f32 %v777_v4, %v2118_v6  ;;  %v2289_v4 = vpop.permute.xlu0 %1055 }
 0x165   : > { %v1576_v51 = vpop.eup %1575  ;;  %1601 = vpow2.f32 %v2215_v12  ;;  %v949_v53 = vmul.f32 %v1574_v21, %v2140_v22  ;;  %v877_v12 = vmul.f32 1.442695, %v817_v62  ;;  %v967_v15 = vmul.f32 %v1568_v58, %v2128_v13 }
 0x166   : > { %v1578_v49 = vpop.eup %1577  ;;  %1603 = vpow2.f32 %v837_v52  ;;  %v804_v19 = vsub.f32 0.0, %v2258_v36  ;;  %v951_v54 = vmul.f32 %v1570_v5, %v2130_v14  ;;  %v820_v22 = vsub.f32 0.0, %v2264_v43  ;;  %v2294_v5 = vpop.permute.xlu1 %1135 }
 0x167   : > { %v1580_v7 = vpop.eup %1579  ;;  %1605 = vpow2.f32 %v869_v24  ;;  %v1189_v6 = vmul.f32 %v2187_v0, %v965_v17  ;;  %v1173_v58 = vmul.f32 %v2124_v9, %v949_v53  ;;  %v1191_v17 = vmul.f32 %v2203_v45, %v967_v15 }
 0x168   : > { %v1582_v8 = vpop.eup %1581  ;;  %v966_v61 = vmul.f32 %v1580_v7, %v2149_v35  ;;  %1607 = vpow2.f32 %v843_v2  ;;  %v802_v35 = vsub.f32 0.0, %v2270_v56  ;;  %v851_v0 = vmul.f32 1.442695, %v804_v19 }
 0x169   : > { %v2279_v63 = vpop.eup %1583  ;;  %v950_v28 = vmul.f32 %v1582_v8, %v2153_v38  ;;  %1609 = vpow2.f32 %v875_v60  ;;  %v818_v38 = vsub.f32 0.0, %v2274_v29  ;;  %v883_v1 = vmul.f32 1.442695, %v820_v22 }
 0x16a   : > { %v2284_v21 = vpop.eup %1585  ;;  %v1190_v13 = vmul.f32 %v2201_v32, %v966_v61  ;;  %1611 = vpow2.f32 %v839_v42  ;;  %v1175_v9 = vmul.f32 %v2132_v16, %v951_v54  ;;  %v847_v42 = vmul.f32 1.442695, %v802_v35  ;;  %v2304_v61 = vpop.permute.xlu0 %1060 }
 0x16b   : > { %v1588_v62 = vpop.eup %1587  ;;  %v1174_v14 = vmul.f32 %v2126_v10, %v950_v28  ;;  %1613 = vpow2.f32 %v871_v25  ;;  %v952_v10 = vmul.f32 %v1578_v49, %v2146_v30  ;;  %v879_v7 = vmul.f32 1.442695, %v818_v38  ;;  %v2306_v54 = vpop.permute.xlu1 %1140 }
 0x16c   : > { %v1590_v60 = vpop.eup %1589  ;;  %1615 = vpow2.f32 %v849_v39  ;;  %v1226_v24 = vadd.f32 %v1190_v13, %v1189_v6  ;;  %v968_v39 = vmul.f32 %v1576_v51, %v2143_v27 }
 0x16d   : > { %v2296_v52 = vpop.eup %1591  ;;  %v1205_v32 = vadd.f32 %v1174_v14, %v1173_v58  ;;  %1617 = vpow2.f32 %v881_v47  ;;  %v1176_v30 = vmul.f32 %v2137_v20, %v952_v10  ;;  %v953_v49 = vmul.f32 %v1590_v60, %v2171_v23 }
 0x16e   : > { %v2298_v2 = vpop.eup %1593  ;;  %1619 = vpow2.f32 %v845_v41  ;;  %v1227_v19 = vadd.f32 %v1226_v24, %v1191_v17  ;;  %v1192_v51 = vmul.f32 %v2213_v46, %v968_v39  ;;  %v969_v41 = vmul.f32 %v1588_v62, %v2167_v18  ;;  %v2315_v62 = vpop.permute.xlu0 %1065 }
 0x16f   : > { %v1596_v25 = vpop.eup %1595  ;;  %1621 = vpow2.f32 %v877_v12  ;;  %v1206_v8 = vadd.f32 %v1205_v32, %v1175_v9  ;;  %v1177_v14 = vmul.f32 %v2155_v40, %v953_v49  ;;  %v971_v39 = vmul.f32 %v2279_v63, %v2158_v57 }
 0x170   : > { %v1598_v53 = vpop.eup %1597  ;;  %1623 = vpow2.f32 %v851_v0  ;;  %v1228_v35 = vadd.f32 %v1227_v19, %v1192_v51  ;;  %v970_v20 = vmul.f32 %v1596_v25, %v2185_v37  ;;  %v1193_v38 = vmul.f32 %v2218_v44, %v969_v41  ;;  %v2318_v0 = vpop.permute.xlu1 %1145 }
 0x171   : > { %v1600_v47 = vpop.eup %1599  ;;  %1625 = vpow2.f32 %v883_v1  ;;  %v1207_v28 = vadd.f32 %v1206_v8, %v1176_v30  ;;  %v954_v22 = vmul.f32 %v1598_v53, %v2191_v48  ;;  %v955_v44 = vmul.f32 %v2284_v21, %v2164_v11 }
 0x172   : > { %v1602_v16 = vpop.eup %1601  ;;  %v895_v45 = vadd.f32 1.0, %v1600_v47  ;;  %1627 = vpow2.f32 %v847_v42  ;;  %v1229_v9 = vadd.f32 %v1228_v35, %v1193_v38  ;;  %v1194_v40 = vmul.f32 %v2243_v3, %v970_v20  ;;  %v2326_v3 = vpop.permute.xlu0 %1070 }
 0x173   : > { %v1604_v27 = vpop.eup %1603  ;;  %v911_v12 = vadd.f32 1.0, %v1602_v16  ;;  %1629 = vpow2.f32 %v879_v7  ;;  %v1208_v32 = vadd.f32 %v1207_v28, %v1177_v14  ;;  %v1178_v37 = vmul.f32 %v2160_v59, %v954_v22 }
 0x174   : > { %v1606_v15 = vpop.eup %1605  ;;  %1631 = vrcp.f32 %v895_v45  ;;  %v893_v6 = vadd.f32 1.0, %v1604_v27  ;;  %v1230_v19 = vadd.f32 %v1229_v9, %v1194_v40  ;;  %v2328_v11 = vpop.permute.xlu1 %1150  ;;  %v1179_v21 = vmul.f32 %v2181_v33, %v955_v44  ;;  %v2428_v27 = vld [vmem:[#allocation6_spill] sm:$0xff]  ;;  %v2432_v40 = vld [vmem:[#allocation13_spill] sm:$0xff] }
 0x175   : > { %v1608_v13 = vpop.eup %1607  ;;  %1633 = vrcp.f32 %v911_v12  ;;  %v909_v23 = vadd.f32 1.0, %v1606_v15  ;;  %v1209_v53 = vadd.f32 %v1208_v32, %v1178_v37  ;;  %v956_v57 = vmul.f32 %v2298_v2, %v2179_v31 }
 0x176   : > { %v1610_v58 = vpop.eup %1609  ;;  %1635 = vrcp.f32 %v893_v6  ;;  %v896_v46 = vadd.f32 1.0, %v1608_v13  ;;  %v1195_v45 = vmul.f32 %v2249_v34, %v971_v39  ;;  %v972_v51 = vmul.f32 %v2296_v52, %v2428_v27  ;;  %v1076_v35 = vpop.permute.xlu0 %1075 }
 0x177   : > { %v1612_v18 = vpop.eup %1611  ;;  %1637 = vrcp.f32 %v909_v23  ;;  %v912_v48 = vadd.f32 1.0, %v1610_v58  ;;  %v1210_v15 = vadd.f32 %v1209_v53, %v1179_v21  ;;  %v1180_v31 = vmul.f32 %v2260_v26, %v956_v57  ;;  %v2429_v23 = vld [vmem:[#allocation10_spill] sm:$0xff] }
 0x178   : > { %v1614_v60 = vpop.eup %1613  ;;  %1639 = vrcp.f32 %v896_v46  ;;  %v894_v24 = vadd.f32 1.0, %v1612_v18  ;;  %v1231_v6 = vadd.f32 %v1230_v19, %v1195_v45  ;;  %v1196_v34 = vmul.f32 %v2266_v55, %v972_v51  ;;  %v1156_v20 = vpop.permute.xlu1 %1155  ;;  %v2430_v18 = vld [vmem:[#allocation9_spill] sm:$0xff] }
 0x179   : > { %v1616_v1 = vpop.eup %1615  ;;  %1641 = vrcp.f32 %v912_v48  ;;  %v910_v10 = vadd.f32 1.0, %v1614_v60  ;;  %v1211_v14 = vadd.f32 %v1210_v15, %v1180_v31 }
 0x17a   : > { %v1618_v42 = vpop.eup %1617  ;;  %1643 = vrcp.f32 %v894_v24  ;;  %v899_v25 = vadd.f32 1.0, %v1616_v1  ;;  %v1232_v48 = vadd.f32 %v1231_v6, %v1196_v34  ;;  %v2431_v1 = vld [vmem:[#allocation8_spill] sm:$0xff]  ;;  %v1081_v44 = vpop.permute.xlu0 %1080 }
 0x17b   : > { %v1620_v17 = vpop.eup %1619  ;;  %1645 = vrcp.f32 %v910_v10  ;;  %v915_v59 = vadd.f32 1.0, %v1618_v42 }
 0x17c   : > { %v1622_v7 = vpop.eup %1621  ;;  %1647 = vrcp.f32 %v899_v25  ;;  %v897_v8 = vadd.f32 1.0, %v1620_v17  ;;  %v2433_v25 = vld [vmem:[#allocation7_spill] sm:$0xff] }
 0x17d   : > { %v1624_v47 = vpop.eup %1623  ;;  %1649 = vrcp.f32 %v915_v59  ;;  %v913_v16 = vadd.f32 1.0, %v1622_v7  ;;  %v2434_v59 = vld [vmem:[#allocation14_spill] sm:$0xff] }
 0x17e   : > { %v1626_v30 = vpop.eup %1625  ;;  %1651 = vrcp.f32 %v897_v8  ;;  %v900_v63 = vadd.f32 1.0, %v1624_v47  ;;  %v1161_v8 = vpop.permute.xlu1 %1160  ;;  %v2435_v47 = vld [vmem:[#allocation11_spill] sm:$0xff] }
 0x17f   : > { %v1628_v49 = vpop.eup %1627  ;;  %1653 = vrcp.f32 %v913_v16  ;;  %v916_v41 = vadd.f32 1.0, %v1626_v30  ;;  %v2436_v16 = vld [vmem:[#allocation12_spill] sm:$0xff] }
 0x180   : > { %v1630_v12 = vpop.eup %1629  ;;  %1655 = vrcp.f32 %v900_v63  ;;  %v898_v28 = vadd.f32 1.0, %v1628_v49 }
 0x181   : > { %v1632_v22 = vpop.eup %1631  ;;  %1657 = vrcp.f32 %v916_v41  ;;  %v914_v33 = vadd.f32 1.0, %v1630_v12  ;;  %v2437_v12 = vld [vmem:[#allocation17_spill] sm:$0xff] }
 0x182   : > { %v1634_v13 = vpop.eup %1633  ;;  %1659 = vrcp.f32 %v898_v28  ;;  %v959_v9 = vmul.f32 %v1632_v22, %v2431_v1 }
 0x183   : > { %v1636_v2 = vpop.eup %1635  ;;  %1661 = vrcp.f32 %v914_v33  ;;  %v975_v17 = vmul.f32 %v1634_v13, %v2433_v25  ;;  %v1086_v33 = vpop.permute.xlu0 %1085 }
 0x184   : > { %v1638_v52 = vpop.eup %1637  ;;  %v957_v58 = vmul.f32 %v1636_v2, %v2429_v23  ;;  %v1183_v63 = vmul.f32 %v2315_v62, %v959_v9  ;;  %v1166_v62 = vpop.permute.xlu1 %1165  ;;  %v2438_v2 = vld [vmem:[#allocation15_spill] sm:$0xff]  ;;  %v2439_v23 = vld [vmem:[#allocation16_spill] sm:$0xff] }
 0x185   : > { %v1640_v46 = vpop.eup %1639  ;;  %v973_v38 = vmul.f32 %v1638_v52, %v2430_v18  ;;  %v1199_v51 = vmul.f32 %v2318_v0, %v975_v17 }
 0x186   : > { %v1642_v60 = vpop.eup %1641  ;;  %v1181_v32 = vmul.f32 %v2289_v4, %v957_v58  ;;  %v960_v4 = vmul.f32 %v1640_v46, %v2435_v47 }
 0x187   : > { %v1644_v37 = vpop.eup %1643  ;;  %v1197_v26 = vmul.f32 %v2294_v5, %v973_v38  ;;  %v976_v30 = vmul.f32 %v1642_v60, %v2436_v16 }
 0x188   : > { %v1646_v24 = vpop.eup %1645  ;;  %v1212_v55 = vadd.f32 %v1211_v14, %v1181_v32  ;;  %v958_v10 = vmul.f32 %v1644_v37, %v2432_v40  ;;  %v1171_v1 = vpop.permute.xlu1 %1170 }
 0x189   : > { %v1648_v42 = vpop.eup %1647  ;;  %v1233_v39 = vadd.f32 %v1232_v48, %v1197_v26  ;;  %v974_v7 = vmul.f32 %v1646_v24, %v2434_v59  ;;  %v1091_v26 = vpop.permute.xlu0 %1090 }
 0x18a   : > { %v1650_v53 = vpop.eup %1649  ;;  %v1182_v19 = vmul.f32 %v2304_v61, %v958_v10  ;;  %v1184_v61 = vmul.f32 %v2326_v3, %v960_v4  ;;  %v963_v34 = vmul.f32 %v1648_v42, %v2438_v2  ;;  %v1250_v4 = vstv %s1249_s26 }
 0x18b   : > { %v1652_v5 = vpop.eup %1651  ;;  %v1198_v21 = vmul.f32 %v2306_v54, %v974_v7  ;;  %v1200_v54 = vmul.f32 %v2328_v11, %v976_v30  ;;  %v979_v58 = vmul.f32 %v1650_v53, %v2439_v23 }
 0x18c   : > { %v1654_v57 = vpop.eup %1653  ;;  %v1213_v49 = vadd.f32 %v1212_v55, %v1182_v19  ;;  %v961_v45 = vmul.f32 %v1652_v5, %v2241_v50  ;;  %v1187_v37 = vmul.f32 %v1086_v33, %v963_v34 }
 0x18d   : > { %v1656_v27 = vpop.eup %1655  ;;  %v1234_v41 = vadd.f32 %v1233_v39, %v1198_v21  ;;  %v977_v15 = vmul.f32 %v1654_v57, %v2437_v12  ;;  %v1203_v24 = vmul.f32 %v1166_v62, %v979_v58 }
 0x18e   : > { %v1658_v28 = vpop.eup %1657  ;;  %v1214_v22 = vadd.f32 %v1213_v49, %v1183_v63  ;;  %v1185_v50 = vmul.f32 %v1076_v35, %v961_v45  ;;  %v964_v38 = vmul.f32 %v1656_v27, %v2258_v36 }
 0x18f   : > { %v1660_v6 = vpop.eup %1659  ;;  %v1235_v13 = vadd.f32 %v1234_v41, %v1199_v51  ;;  %v1201_v14 = vmul.f32 %v1156_v20, %v977_v15  ;;  %v980_v60 = vmul.f32 %v1658_v28, %v2264_v43 }
 0x190   : > { %v1662_v31 = vpop.eup %1661  ;;  %v1215_v52 = vadd.f32 %v1214_v22, %v1184_v61  ;;  %v962_v0 = vmul.f32 %v1660_v6, %v2270_v56  ;;  %v1188_v9 = vmul.f32 %v1091_v26, %v964_v38 }
 0x191   : > { %v1236_v46 = vadd.f32 %v1235_v13, %v1200_v54  ;;  %v978_v3 = vmul.f32 %v1662_v31, %v2274_v29  ;;  %v1204_v55 = vmul.f32 %v1171_v1, %v980_v60 }
 0x192   : > { %v1216_v18 = vadd.f32 %v1215_v52, %v1185_v50  ;;  %v1186_v48 = vmul.f32 %v1081_v44, %v962_v0 }
 0x193   : > { %v1237_v11 = vadd.f32 %v1236_v46, %v1201_v14  ;;  %v1202_v32 = vmul.f32 %v1161_v8, %v978_v3 }
 0x194   : > { %v1217_v35 = vadd.f32 %v1216_v18, %v1186_v48 }
 0x195   : > { %v1238_v56 = vadd.f32 %v1237_v11, %v1202_v32 }
 0x196   : > { %v1218_v20 = vadd.f32 %v1217_v35, %v1187_v37 }
 0x197   : > { %v1239_v40 = vadd.f32 %v1238_v56, %v1203_v24 }
 0x198   : > { %v1219_v29 = vadd.f32 %v1218_v20, %v1188_v9 }
 0x199   : > { %v1240_v10 = vadd.f32 %v1239_v40, %v1204_v55 }
 0x19a   : > { %v1220_v42 = vrot.slane %v1219_v29, 4 }
 0x19b   : > { %v1241_v36 = vrot.slane %v1240_v10, 4 }
 0x19c   : > { %v1221_v44 = vadd.f32 %v1220_v42, %v1219_v29 }
 0x19d   : > { %v1242_v43 = vadd.f32 %v1241_v36, %v1240_v10 }
 0x19e   : > { %v1222_v25 = vrot.slane %v1221_v44, 2 }
 0x19f   : > { %v1243_v17 = vrot.slane %v1242_v43, 2 }
 0x1a0   : > { %v1223_v39 = vadd.f32 %v1222_v25, %v1221_v44 }
 0x1a1   : > { %v1244_v59 = vadd.f32 %v1243_v17, %v1242_v43 }
 0x1a2   : > { %v1224_v7 = vrot.slane %v1223_v39, 1 }
 0x1a3   : > { %v1245_v53 = vrot.slane %v1244_v59, 1 }
 0x1a4   : > { %v1225_v8 = vadd.f32 %v1224_v7, %v1223_v39 }
 0x1a5   : > { %v1246_v47 = vadd.f32 %v1245_v53, %v1244_v59 }
 0x1a7   : > { %v1248_v19 = vsel %vm1247_vm1, %v1225_v8, %v1246_v47 }
 0x1a8   : > { %v1251_v5 = vadd.f32 %v1250_v4, %v1248_v19 }
 0x1aa   : > { %1252 = vst [vmem:[%s219_s27] sm:$0x3] %v1251_v5 }
 0x1ab   : > { %1676 = shalt.err (!%p1673_p3)
}
 0x1ac   : > { %s1677_s16 = scalar_lea.hbm %s1265_s11, 32  ;;  %s1681_s19 = scalar_lea.hbm %s2401_s5, 64 }
 0x1ad   : > { %p1678_p4 = scmp.ne.s32.totalorder %s1265_s11, %s1677_s16  ;;  %p1682_p9 = scmp.lt.s32.totalorder %s1265_s11, %s2401_s5 }
 0x1ae   : > { %p1683_p10 = scmp.lt.s32.totalorder %s1681_s19, %s1677_s16 }
 0x1af   : > { %p1679_p7 = pnand %p1678_p4, %p1798_p5 }
 0x1b0   : > { %p1684_p11 = por %p1683_p10, %p1682_p9 }
 0x1b1   : > { %p1680_p8 = pneg %p1679_p7 }
 0x1b3   : > { %p1685_p12 = pnand %p1684_p11, %p1680_p8 }
 0x1b5   : > { %1688 = shalt.err (!%p1685_p12)
}
 0x1b6   : > { %1473 = dma.vmem_to_hbm [thread:$0]  (%p1798_p5), %s1268_s8, 32, %s1265_s11, %s1254_s12  }
 0x1b7 PF: > { %p1479_p13 = scmp.ge.s32.totalorder %s1723_s23, 2  ;;  %s1279_s6 = sand.u32 1, %s1711_s20  }
 0x1b8   : > { %s1280_s7 = scalar_lea.sflag [#allocation4], %s1279_s6 }
 0x1b9   : > { %p1476_p0 = pnand %p1479_p13, %p1802_p6 }
 0x1bb   : > { %p1477_p1 = pneg %p1476_p0 }
 0x1bd   : > { %1706 = dma.done.wait (%p1477_p1), %s1280_s7, 32  }
 0x1be   : > { %1708 = vsyncadd (%p1477_p1), %s1280_s7, 4294967264  ;;  %p16_p2 = scmp.ge.s32.totalorder %s1785_s25, 4   ;;  %s2440_s20 = smov %s1715_s21 }
 0x1bf   : > { %s2441_s21 = smov %s1719_s22  ;;  %s2442_s22 = smov %s1796_s28 }
 0x1c0   : > { %s2443_s23 = smov %s1785_s25  ;;  %18 = sbr.rel (!%p16_p2) target bundleno = 5 (0x5), region = 75 }
 0x1c5   :  { %1285 = vsyncpa [#allocation4], 1 }
 0x1c6   :  { %1287 = vsyncpa [#allocation4 + $0x1], 1 }

</bundles_post_ra>
